<compile_context>
chip_gen: v5e
topology: v5e:2x2
jax: 0.10.0
libtpu: 0.0.40
codegen_flags: <defaults>
</compile_context>

<pallas_src>
import math
import jax
import jax.numpy as jnp
from jax import lax
from jax.experimental import pallas as pl
from jax.experimental.pallas import tpu as pltpu

LAYER_SIZES = [3, 3, 3, 3, 3, 1]

_LANE = 128
_C1 = math.sqrt(2.0 / math.pi)
_C2 = _C1 * 0.044715
_SPLIT_MIN = 8192               # batch elems above which a single-step grid is split in two
_VMEM_BUDGET = 24 * 1024 * 1024  # keep double-buffered in+out under this (v7x has 64 MiB VMEM)


def _gelu_tanh(v):
    # 0.5*x*(1+tanh(sqrt(2/pi)*(x+0.044715*x^3)))  ==  0.5*x*(1+tanh(x*(C1 + C2*x*x)))
    u = v * (_C1 + _C2 * (v * v))
    return 0.5 * v * (1.0 + jnp.tanh(u))


def _round_up(a, m):
    return ((a + m - 1) // m) * m


def _choose_tile(batch, f0, out_dim, batch_tile, chunk):
    """Pick the per-grid-step batch tile (in elements) and the padded batch size."""
    sub = chunk * _LANE                                  # minimal granularity (chunk sublanes)
    bytes_per_elem = 2 * (f0 + out_dim) * 4              # double-buffered in + out, f32
    tb_cap = max(sub, (_VMEM_BUDGET // bytes_per_elem) // sub * sub)
    tb_cap = min(tb_cap, _round_up(batch_tile, sub))
    b_min = _round_up(batch, sub)
    if b_min <= tb_cap:
        if b_min >= 2 * _SPLIT_MIN:
            # whole batch would be one step; split so both v7x TensorCores get work
            tb = _round_up((b_min + 1) // 2, sub)
        else:
            tb = b_min
    else:
        tb = tb_cap
    b_pad = _round_up(batch, tb)
    return tb, b_pad


def _make_kernel(use_shortcut, sizes, chunk, num_chunks):
    num_layers = len(sizes) - 1
    f0 = sizes[0]
    unroll = max(1, min(4, num_chunks))

    def kernel(params_ref, x_ref, o_ref):
        # Hoist all scalar parameter reads (SMEM -> sreg) above the chunk loop.
        off = 0
        W, Bv = [], []
        for li in range(num_layers):
            fi, fo = sizes[li], sizes[li + 1]
            W.append([[params_ref[off + k * fo + j] for j in range(fo)] for k in range(fi)])
            Bv.append([params_ref[off + fi * fo + j] for j in range(fo)])
            off += fi * fo + fo

        def body(i, carry):
            r0 = pl.multiple_of(i * chunk, chunk)
            # (chunk, 128) slab per input feature -- full sublane+lane dense vregs.
            h = [x_ref[k, pl.ds(r0, chunk), :] for k in range(f0)]
            for li in range(num_layers):
                fi, fo = sizes[li], sizes[li + 1]
                new_h = []
                for j in range(fo):
                    # unrolled scalar x vector FMAs on the VPU
                    acc = h[0] * W[li][0][j]
                    for k in range(1, fi):
                        acc = acc + h[k] * W[li][k][j]
                    acc = acc + Bv[li][j]
                    g = _gelu_tanh(acc)                 # tanh rides the EUP slot
                    if use_shortcut and fi == fo:
                        g = g + h[j]                    # residual: x + gelu(Wx + b)
                    new_h.append(g)
                h = new_h
            for j, row in enumerate(h):
                o_ref[j, pl.ds(r0, chunk), :] = row.astype(o_ref.dtype)
            return carry

        lax.fori_loop(0, num_chunks, body, 0, unroll=unroll)

    return kernel


def pack_params(weights, biases):
    """Pack all weights/biases into one flat f32 SMEM buffer. Call ONCE, outside the hot path."""
    flat = []
    for w, b in zip(weights, biases):
        flat.append(jnp.asarray(w, jnp.float32).reshape(-1))   # row-major (in, out)
        flat.append(jnp.asarray(b, jnp.float32).reshape(-1))
    return jnp.concatenate(flat)


def example_dnn_forward(x, packed_params, layer_sizes, use_shortcut,
                        *, batch_tile: int = 131072, chunk: int = 8):
    """x: (B, layer_sizes[0]) f32; packed_params from pack_params(). Returns (B, layer_sizes[-1])."""
    B, f0 = x.shape
    sizes = tuple(int(s) for s in layer_sizes)
    assert f0 == sizes[0], (f0, sizes)
    out_dim = sizes[-1]

    tb, b_pad = _choose_tile(B, f0, out_dim, batch_tile, chunk)
    rows = tb // _LANE
    num_chunks = rows // chunk
    grid = (b_pad // tb,)

    # Single pad + transpose + reshape: feature-major, batch folded onto (sublane, lane).
    # TODO(synk): at very large B a feature-major caller-side layout would skip this extra pass.
    x32 = jnp.pad(x.astype(jnp.float32), ((0, b_pad - B), (0, 0)))
    xt = x32.T.reshape(f0, b_pad // _LANE, _LANE)

    kernel = _make_kernel(use_shortcut, sizes, chunk, num_chunks)

    out_t = pl.pallas_call(
        kernel,
        out_shape=jax.ShapeDtypeStruct((out_dim, b_pad // _LANE, _LANE), jnp.float32),
        grid=grid,
        in_specs=[
            pl.BlockSpec(memory_space=pltpu.MemorySpace.SMEM),      # packed params, whole array
            pl.BlockSpec((f0, rows, _LANE), lambda i: (0, i, 0)),   # activation block
        ],
        out_specs=pl.BlockSpec((out_dim, rows, _LANE), lambda i: (0, i, 0)),
        compiler_params=pltpu.CompilerParams(dimension_semantics=("parallel",)),
    )(packed_params, xt)

    return out_t.reshape(out_dim, b_pad)[:, :B].T   # (B, out_dim)


def init_params(key, layer_sizes):
    """Deterministic init mimicking nn.Linear's U(-1/sqrt(in), 1/sqrt(in)); W stored (in, out)."""
    weights, biases = [], []
    for i in range(len(layer_sizes) - 1):
        fan_in, fan_out = layer_sizes[i], layer_sizes[i + 1]
        key, kw, kb = jax.random.split(key, 3)
        bound = 1.0 / math.sqrt(fan_in)
        weights.append(jax.random.uniform(kw, (fan_in, fan_out), jnp.float32, -bound, bound))
        biases.append(jax.random.uniform(kb, (1, fan_out), jnp.float32, -bound, bound))
    return weights, biases


def reference_forward(x, weights, biases, use_shortcut):
    # Pure-JAX reference in exact f32 (broadcast-multiply + sum; no MXU decomposition).
    h = x.astype(jnp.float32)
    for w, b in zip(weights, biases):
        y = (h[:, :, None] * w[None, :, :]).sum(axis=1) + b
        y = _gelu_tanh(y)
        if use_shortcut and h.shape == y.shape:
            h = h + y
        else:
            h = y
    return h


if __name__ == "__main__":
    key = jax.random.PRNGKey(0)
    key, kx = jax.random.split(key)

    batch = 8
    x = jax.random.normal(kx, (batch, LAYER_SIZES[0]), jnp.float32)
    weights, biases = init_params(key, LAYER_SIZES)
    params = pack_params(weights, biases)        # packed once, outside the per-call path

    use_shortcut = True
    out = example_dnn_forward(x, params, LAYER_SIZES, use_shortcut)
    out = jax.block_until_ready(out)

    ref = reference_forward(x, weights, biases, use_shortcut)
    assert out.shape == (batch, LAYER_SIZES[-1]), out.shape
    assert jnp.allclose(out, ref, atol=1e-5, rtol=1e-5), "mismatch vs reference"

    print("KERNEL_OK")
</pallas_src>

<mosaic_0001>
module attributes {stable_mosaic.version = 11 : i64} {
  func.func @kernel(%arg0: i32, %arg1: memref<52xf32, #tpu.memory_space<smem>>, %arg2: memref<3x8x128xf32, #tpu.memory_space<vmem>>, %arg3: memref<1x8x128xf32, #tpu.memory_space<vmem>>) attributes {dimension_semantics = [#tpu.dimension_semantics<parallel>], iteration_bounds = array<i64: 1>, scalar_prefetch = 0 : i64, scratch_operands = 0 : i64, tpu.core_type = #tpu.core_type<tc>, window_params = [{transform_indices = @transform_0, window_bounds = array<i64: 52>}, {transform_indices = @transform_1, window_bounds = array<i64: 3, 8, 128>}, {transform_indices = @transform_2, window_bounds = array<i64: 1, 8, 128>}]} {
    %c0 = arith.constant 0 : index
    %0 = memref.load %arg1[%c0] : memref<52xf32, #tpu.memory_space<smem>>
    %c1 = arith.constant 1 : index
    %1 = memref.load %arg1[%c1] : memref<52xf32, #tpu.memory_space<smem>>
    %c2 = arith.constant 2 : index
    %2 = memref.load %arg1[%c2] : memref<52xf32, #tpu.memory_space<smem>>
    %c3 = arith.constant 3 : index
    %3 = memref.load %arg1[%c3] : memref<52xf32, #tpu.memory_space<smem>>
    %c4 = arith.constant 4 : index
    %4 = memref.load %arg1[%c4] : memref<52xf32, #tpu.memory_space<smem>>
    %c5 = arith.constant 5 : index
    %5 = memref.load %arg1[%c5] : memref<52xf32, #tpu.memory_space<smem>>
    %c6 = arith.constant 6 : index
    %6 = memref.load %arg1[%c6] : memref<52xf32, #tpu.memory_space<smem>>
    %c7 = arith.constant 7 : index
    %7 = memref.load %arg1[%c7] : memref<52xf32, #tpu.memory_space<smem>>
    %c8 = arith.constant 8 : index
    %8 = memref.load %arg1[%c8] : memref<52xf32, #tpu.memory_space<smem>>
    %c9 = arith.constant 9 : index
    %9 = memref.load %arg1[%c9] : memref<52xf32, #tpu.memory_space<smem>>
    %c10 = arith.constant 10 : index
    %10 = memref.load %arg1[%c10] : memref<52xf32, #tpu.memory_space<smem>>
    %c11 = arith.constant 11 : index
    %11 = memref.load %arg1[%c11] : memref<52xf32, #tpu.memory_space<smem>>
    %c12 = arith.constant 12 : index
    %12 = memref.load %arg1[%c12] : memref<52xf32, #tpu.memory_space<smem>>
    %c13 = arith.constant 13 : index
    %13 = memref.load %arg1[%c13] : memref<52xf32, #tpu.memory_space<smem>>
    %c14 = arith.constant 14 : index
    %14 = memref.load %arg1[%c14] : memref<52xf32, #tpu.memory_space<smem>>
    %c15 = arith.constant 15 : index
    %15 = memref.load %arg1[%c15] : memref<52xf32, #tpu.memory_space<smem>>
    %c16 = arith.constant 16 : index
    %16 = memref.load %arg1[%c16] : memref<52xf32, #tpu.memory_space<smem>>
    %c17 = arith.constant 17 : index
    %17 = memref.load %arg1[%c17] : memref<52xf32, #tpu.memory_space<smem>>
    %c18 = arith.constant 18 : index
    %18 = memref.load %arg1[%c18] : memref<52xf32, #tpu.memory_space<smem>>
    %c19 = arith.constant 19 : index
    %19 = memref.load %arg1[%c19] : memref<52xf32, #tpu.memory_space<smem>>
    %c20 = arith.constant 20 : index
    %20 = memref.load %arg1[%c20] : memref<52xf32, #tpu.memory_space<smem>>
    %c21 = arith.constant 21 : index
    %21 = memref.load %arg1[%c21] : memref<52xf32, #tpu.memory_space<smem>>
    %c22 = arith.constant 22 : index
    %22 = memref.load %arg1[%c22] : memref<52xf32, #tpu.memory_space<smem>>
    %c23 = arith.constant 23 : index
    %23 = memref.load %arg1[%c23] : memref<52xf32, #tpu.memory_space<smem>>
    %c24 = arith.constant 24 : index
    %24 = memref.load %arg1[%c24] : memref<52xf32, #tpu.memory_space<smem>>
    %c25 = arith.constant 25 : index
    %25 = memref.load %arg1[%c25] : memref<52xf32, #tpu.memory_space<smem>>
    %c26 = arith.constant 26 : index
    %26 = memref.load %arg1[%c26] : memref<52xf32, #tpu.memory_space<smem>>
    %c27 = arith.constant 27 : index
    %27 = memref.load %arg1[%c27] : memref<52xf32, #tpu.memory_space<smem>>
    %c28 = arith.constant 28 : index
    %28 = memref.load %arg1[%c28] : memref<52xf32, #tpu.memory_space<smem>>
    %c29 = arith.constant 29 : index
    %29 = memref.load %arg1[%c29] : memref<52xf32, #tpu.memory_space<smem>>
    %c30 = arith.constant 30 : index
    %30 = memref.load %arg1[%c30] : memref<52xf32, #tpu.memory_space<smem>>
    %c31 = arith.constant 31 : index
    %31 = memref.load %arg1[%c31] : memref<52xf32, #tpu.memory_space<smem>>
    %c32 = arith.constant 32 : index
    %32 = memref.load %arg1[%c32] : memref<52xf32, #tpu.memory_space<smem>>
    %c33 = arith.constant 33 : index
    %33 = memref.load %arg1[%c33] : memref<52xf32, #tpu.memory_space<smem>>
    %c34 = arith.constant 34 : index
    %34 = memref.load %arg1[%c34] : memref<52xf32, #tpu.memory_space<smem>>
    %c35 = arith.constant 35 : index
    %35 = memref.load %arg1[%c35] : memref<52xf32, #tpu.memory_space<smem>>
    %c36 = arith.constant 36 : index
    %36 = memref.load %arg1[%c36] : memref<52xf32, #tpu.memory_space<smem>>
    %c37 = arith.constant 37 : index
    %37 = memref.load %arg1[%c37] : memref<52xf32, #tpu.memory_space<smem>>
    %c38 = arith.constant 38 : index
    %38 = memref.load %arg1[%c38] : memref<52xf32, #tpu.memory_space<smem>>
    %c39 = arith.constant 39 : index
    %39 = memref.load %arg1[%c39] : memref<52xf32, #tpu.memory_space<smem>>
    %c40 = arith.constant 40 : index
    %40 = memref.load %arg1[%c40] : memref<52xf32, #tpu.memory_space<smem>>
    %c41 = arith.constant 41 : index
    %41 = memref.load %arg1[%c41] : memref<52xf32, #tpu.memory_space<smem>>
    %c42 = arith.constant 42 : index
    %42 = memref.load %arg1[%c42] : memref<52xf32, #tpu.memory_space<smem>>
    %c43 = arith.constant 43 : index
    %43 = memref.load %arg1[%c43] : memref<52xf32, #tpu.memory_space<smem>>
    %c44 = arith.constant 44 : index
    %44 = memref.load %arg1[%c44] : memref<52xf32, #tpu.memory_space<smem>>
    %c45 = arith.constant 45 : index
    %45 = memref.load %arg1[%c45] : memref<52xf32, #tpu.memory_space<smem>>
    %c46 = arith.constant 46 : index
    %46 = memref.load %arg1[%c46] : memref<52xf32, #tpu.memory_space<smem>>
    %c47 = arith.constant 47 : index
    %47 = memref.load %arg1[%c47] : memref<52xf32, #tpu.memory_space<smem>>
    %c48 = arith.constant 48 : index
    %48 = memref.load %arg1[%c48] : memref<52xf32, #tpu.memory_space<smem>>
    %c49 = arith.constant 49 : index
    %49 = memref.load %arg1[%c49] : memref<52xf32, #tpu.memory_space<smem>>
    %c50 = arith.constant 50 : index
    %50 = memref.load %arg1[%c50] : memref<52xf32, #tpu.memory_space<smem>>
    %c51 = arith.constant 51 : index
    %51 = memref.load %arg1[%c51] : memref<52xf32, #tpu.memory_space<smem>>
    %c0_i32 = arith.constant 0 : i32
    %c8_i32 = arith.constant 8 : i32
    %52 = arith.muli %c0_i32, %c8_i32 : i32
    %53 = tpu.assume_multiple %52, 8 : i32
    %c0_0 = arith.constant 0 : index
    %54 = arith.index_cast %53 : i32 to index
    %c0_1 = arith.constant 0 : index
    %55 = vector.load %arg2[%c0_0, %54, %c0_1] : memref<3x8x128xf32, #tpu.memory_space<vmem>>, vector<1x8x128xf32>
    %56 = vector.shape_cast %55 : vector<1x8x128xf32> to vector<8x128xf32>
    %c1_2 = arith.constant 1 : index
    %57 = arith.index_cast %53 : i32 to index
    %c0_3 = arith.constant 0 : index
    %58 = vector.load %arg2[%c1_2, %57, %c0_3] : memref<3x8x128xf32, #tpu.memory_space<vmem>>, vector<1x8x128xf32>
    %59 = vector.shape_cast %58 : vector<1x8x128xf32> to vector<8x128xf32>
    %c2_4 = arith.constant 2 : index
    %60 = arith.index_cast %53 : i32 to index
    %c0_5 = arith.constant 0 : index
    %61 = vector.load %arg2[%c2_4, %60, %c0_5] : memref<3x8x128xf32, #tpu.memory_space<vmem>>, vector<1x8x128xf32>
    %62 = vector.shape_cast %61 : vector<1x8x128xf32> to vector<8x128xf32>
    %63 = vector.broadcast %0 : f32 to vector<8x128xf32>
    %64 = arith.mulf %56, %63 : vector<8x128xf32>
    %65 = vector.broadcast %3 : f32 to vector<8x128xf32>
    %66 = arith.mulf %59, %65 : vector<8x128xf32>
    %67 = arith.addf %64, %66 : vector<8x128xf32>
    %68 = vector.broadcast %6 : f32 to vector<8x128xf32>
    %69 = arith.mulf %62, %68 : vector<8x128xf32>
    %70 = arith.addf %67, %69 : vector<8x128xf32>
    %71 = vector.broadcast %9 : f32 to vector<8x128xf32>
    %72 = arith.addf %70, %71 : vector<8x128xf32>
    %73 = arith.mulf %72, %72 : vector<8x128xf32>
    %cst = arith.constant 0.0356774069 : f32
    %74 = vector.broadcast %cst : f32 to vector<8x128xf32>
    %75 = arith.mulf %74, %73 : vector<8x128xf32>
    %cst_6 = arith.constant 0.797884583 : f32
    %76 = vector.broadcast %cst_6 : f32 to vector<8x128xf32>
    %77 = arith.addf %76, %75 : vector<8x128xf32>
    %78 = arith.mulf %72, %77 : vector<8x128xf32>
    %cst_7 = arith.constant 5.000000e-01 : f32
    %79 = vector.broadcast %cst_7 : f32 to vector<8x128xf32>
    %80 = arith.mulf %79, %72 : vector<8x128xf32>
    %81 = math.tanh %78 : vector<8x128xf32>
    %cst_8 = arith.constant 1.000000e+00 : f32
    %82 = vector.broadcast %cst_8 : f32 to vector<8x128xf32>
    %83 = arith.addf %82, %81 : vector<8x128xf32>
    %84 = arith.mulf %80, %83 : vector<8x128xf32>
    %85 = arith.addf %84, %56 : vector<8x128xf32>
    %86 = vector.broadcast %1 : f32 to vector<8x128xf32>
    %87 = arith.mulf %56, %86 : vector<8x128xf32>
    %88 = vector.broadcast %4 : f32 to vector<8x128xf32>
    %89 = arith.mulf %59, %88 : vector<8x128xf32>
    %90 = arith.addf %87, %89 : vector<8x128xf32>
    %91 = vector.broadcast %7 : f32 to vector<8x128xf32>
    %92 = arith.mulf %62, %91 : vector<8x128xf32>
    %93 = arith.addf %90, %92 : vector<8x128xf32>
    %94 = vector.broadcast %10 : f32 to vector<8x128xf32>
    %95 = arith.addf %93, %94 : vector<8x128xf32>
    %96 = arith.mulf %95, %95 : vector<8x128xf32>
    %cst_9 = arith.constant 0.0356774069 : f32
    %97 = vector.broadcast %cst_9 : f32 to vector<8x128xf32>
    %98 = arith.mulf %97, %96 : vector<8x128xf32>
    %cst_10 = arith.constant 0.797884583 : f32
    %99 = vector.broadcast %cst_10 : f32 to vector<8x128xf32>
    %100 = arith.addf %99, %98 : vector<8x128xf32>
    %101 = arith.mulf %95, %100 : vector<8x128xf32>
    %cst_11 = arith.constant 5.000000e-01 : f32
    %102 = vector.broadcast %cst_11 : f32 to vector<8x128xf32>
    %103 = arith.mulf %102, %95 : vector<8x128xf32>
    %104 = math.tanh %101 : vector<8x128xf32>
    %cst_12 = arith.constant 1.000000e+00 : f32
    %105 = vector.broadcast %cst_12 : f32 to vector<8x128xf32>
    %106 = arith.addf %105, %104 : vector<8x128xf32>
    %107 = arith.mulf %103, %106 : vector<8x128xf32>
    %108 = arith.addf %107, %59 : vector<8x128xf32>
    %109 = vector.broadcast %2 : f32 to vector<8x128xf32>
    %110 = arith.mulf %56, %109 : vector<8x128xf32>
    %111 = vector.broadcast %5 : f32 to vector<8x128xf32>
    %112 = arith.mulf %59, %111 : vector<8x128xf32>
    %113 = arith.addf %110, %112 : vector<8x128xf32>
    %114 = vector.broadcast %8 : f32 to vector<8x128xf32>
    %115 = arith.mulf %62, %114 : vector<8x128xf32>
    %116 = arith.addf %113, %115 : vector<8x128xf32>
    %117 = vector.broadcast %11 : f32 to vector<8x128xf32>
    %118 = arith.addf %116, %117 : vector<8x128xf32>
    %119 = arith.mulf %118, %118 : vector<8x128xf32>
    %cst_13 = arith.constant 0.0356774069 : f32
    %120 = vector.broadcast %cst_13 : f32 to vector<8x128xf32>
    %121 = arith.mulf %120, %119 : vector<8x128xf32>
    %cst_14 = arith.constant 0.797884583 : f32
    %122 = vector.broadcast %cst_14 : f32 to vector<8x128xf32>
    %123 = arith.addf %122, %121 : vector<8x128xf32>
    %124 = arith.mulf %118, %123 : vector<8x128xf32>
    %cst_15 = arith.constant 5.000000e-01 : f32
    %125 = vector.broadcast %cst_15 : f32 to vector<8x128xf32>
    %126 = arith.mulf %125, %118 : vector<8x128xf32>
    %127 = math.tanh %124 : vector<8x128xf32>
    %cst_16 = arith.constant 1.000000e+00 : f32
    %128 = vector.broadcast %cst_16 : f32 to vector<8x128xf32>
    %129 = arith.addf %128, %127 : vector<8x128xf32>
    %130 = arith.mulf %126, %129 : vector<8x128xf32>
    %131 = arith.addf %130, %62 : vector<8x128xf32>
    %132 = vector.broadcast %12 : f32 to vector<8x128xf32>
    %133 = arith.mulf %85, %132 : vector<8x128xf32>
    %134 = vector.broadcast %15 : f32 to vector<8x128xf32>
    %135 = arith.mulf %108, %134 : vector<8x128xf32>
    %136 = arith.addf %133, %135 : vector<8x128xf32>
    %137 = vector.broadcast %18 : f32 to vector<8x128xf32>
    %138 = arith.mulf %131, %137 : vector<8x128xf32>
    %139 = arith.addf %136, %138 : vector<8x128xf32>
    %140 = vector.broadcast %21 : f32 to vector<8x128xf32>
    %141 = arith.addf %139, %140 : vector<8x128xf32>
    %142 = arith.mulf %141, %141 : vector<8x128xf32>
    %cst_17 = arith.constant 0.0356774069 : f32
    %143 = vector.broadcast %cst_17 : f32 to vector<8x128xf32>
    %144 = arith.mulf %143, %142 : vector<8x128xf32>
    %cst_18 = arith.constant 0.797884583 : f32
    %145 = vector.broadcast %cst_18 : f32 to vector<8x128xf32>
    %146 = arith.addf %145, %144 : vector<8x128xf32>
    %147 = arith.mulf %141, %146 : vector<8x128xf32>
    %cst_19 = arith.constant 5.000000e-01 : f32
    %148 = vector.broadcast %cst_19 : f32 to vector<8x128xf32>
    %149 = arith.mulf %148, %141 : vector<8x128xf32>
    %150 = math.tanh %147 : vector<8x128xf32>
    %cst_20 = arith.constant 1.000000e+00 : f32
    %151 = vector.broadcast %cst_20 : f32 to vector<8x128xf32>
    %152 = arith.addf %151, %150 : vector<8x128xf32>
    %153 = arith.mulf %149, %152 : vector<8x128xf32>
    %154 = arith.addf %153, %85 : vector<8x128xf32>
    %155 = vector.broadcast %13 : f32 to vector<8x128xf32>
    %156 = arith.mulf %85, %155 : vector<8x128xf32>
    %157 = vector.broadcast %16 : f32 to vector<8x128xf32>
    %158 = arith.mulf %108, %157 : vector<8x128xf32>
    %159 = arith.addf %156, %158 : vector<8x128xf32>
    %160 = vector.broadcast %19 : f32 to vector<8x128xf32>
    %161 = arith.mulf %131, %160 : vector<8x128xf32>
    %162 = arith.addf %159, %161 : vector<8x128xf32>
    %163 = vector.broadcast %22 : f32 to vector<8x128xf32>
    %164 = arith.addf %162, %163 : vector<8x128xf32>
    %165 = arith.mulf %164, %164 : vector<8x128xf32>
    %cst_21 = arith.constant 0.0356774069 : f32
    %166 = vector.broadcast %cst_21 : f32 to vector<8x128xf32>
    %167 = arith.mulf %166, %165 : vector<8x128xf32>
    %cst_22 = arith.constant 0.797884583 : f32
    %168 = vector.broadcast %cst_22 : f32 to vector<8x128xf32>
    %169 = arith.addf %168, %167 : vector<8x128xf32>
    %170 = arith.mulf %164, %169 : vector<8x128xf32>
    %cst_23 = arith.constant 5.000000e-01 : f32
    %171 = vector.broadcast %cst_23 : f32 to vector<8x128xf32>
    %172 = arith.mulf %171, %164 : vector<8x128xf32>
    %173 = math.tanh %170 : vector<8x128xf32>
    %cst_24 = arith.constant 1.000000e+00 : f32
    %174 = vector.broadcast %cst_24 : f32 to vector<8x128xf32>
    %175 = arith.addf %174, %173 : vector<8x128xf32>
    %176 = arith.mulf %172, %175 : vector<8x128xf32>
    %177 = arith.addf %176, %108 : vector<8x128xf32>
    %178 = vector.broadcast %14 : f32 to vector<8x128xf32>
    %179 = arith.mulf %85, %178 : vector<8x128xf32>
    %180 = vector.broadcast %17 : f32 to vector<8x128xf32>
    %181 = arith.mulf %108, %180 : vector<8x128xf32>
    %182 = arith.addf %179, %181 : vector<8x128xf32>
    %183 = vector.broadcast %20 : f32 to vector<8x128xf32>
    %184 = arith.mulf %131, %183 : vector<8x128xf32>
    %185 = arith.addf %182, %184 : vector<8x128xf32>
    %186 = vector.broadcast %23 : f32 to vector<8x128xf32>
    %187 = arith.addf %185, %186 : vector<8x128xf32>
    %188 = arith.mulf %187, %187 : vector<8x128xf32>
    %cst_25 = arith.constant 0.0356774069 : f32
    %189 = vector.broadcast %cst_25 : f32 to vector<8x128xf32>
    %190 = arith.mulf %189, %188 : vector<8x128xf32>
    %cst_26 = arith.constant 0.797884583 : f32
    %191 = vector.broadcast %cst_26 : f32 to vector<8x128xf32>
    %192 = arith.addf %191, %190 : vector<8x128xf32>
    %193 = arith.mulf %187, %192 : vector<8x128xf32>
    %cst_27 = arith.constant 5.000000e-01 : f32
    %194 = vector.broadcast %cst_27 : f32 to vector<8x128xf32>
    %195 = arith.mulf %194, %187 : vector<8x128xf32>
    %196 = math.tanh %193 : vector<8x128xf32>
    %cst_28 = arith.constant 1.000000e+00 : f32
    %197 = vector.broadcast %cst_28 : f32 to vector<8x128xf32>
    %198 = arith.addf %197, %196 : vector<8x128xf32>
    %199 = arith.mulf %195, %198 : vector<8x128xf32>
    %200 = arith.addf %199, %131 : vector<8x128xf32>
    %201 = vector.broadcast %24 : f32 to vector<8x128xf32>
    %202 = arith.mulf %154, %201 : vector<8x128xf32>
    %203 = vector.broadcast %27 : f32 to vector<8x128xf32>
    %204 = arith.mulf %177, %203 : vector<8x128xf32>
    %205 = arith.addf %202, %204 : vector<8x128xf32>
    %206 = vector.broadcast %30 : f32 to vector<8x128xf32>
    %207 = arith.mulf %200, %206 : vector<8x128xf32>
    %208 = arith.addf %205, %207 : vector<8x128xf32>
    %209 = vector.broadcast %33 : f32 to vector<8x128xf32>
    %210 = arith.addf %208, %209 : vector<8x128xf32>
    %211 = arith.mulf %210, %210 : vector<8x128xf32>
    %cst_29 = arith.constant 0.0356774069 : f32
    %212 = vector.broadcast %cst_29 : f32 to vector<8x128xf32>
    %213 = arith.mulf %212, %211 : vector<8x128xf32>
    %cst_30 = arith.constant 0.797884583 : f32
    %214 = vector.broadcast %cst_30 : f32 to vector<8x128xf32>
    %215 = arith.addf %214, %213 : vector<8x128xf32>
    %216 = arith.mulf %210, %215 : vector<8x128xf32>
    %cst_31 = arith.constant 5.000000e-01 : f32
    %217 = vector.broadcast %cst_31 : f32 to vector<8x128xf32>
    %218 = arith.mulf %217, %210 : vector<8x128xf32>
    %219 = math.tanh %216 : vector<8x128xf32>
    %cst_32 = arith.constant 1.000000e+00 : f32
    %220 = vector.broadcast %cst_32 : f32 to vector<8x128xf32>
    %221 = arith.addf %220, %219 : vector<8x128xf32>
    %222 = arith.mulf %218, %221 : vector<8x128xf32>
    %223 = arith.addf %222, %154 : vector<8x128xf32>
    %224 = vector.broadcast %25 : f32 to vector<8x128xf32>
    %225 = arith.mulf %154, %224 : vector<8x128xf32>
    %226 = vector.broadcast %28 : f32 to vector<8x128xf32>
    %227 = arith.mulf %177, %226 : vector<8x128xf32>
    %228 = arith.addf %225, %227 : vector<8x128xf32>
    %229 = vector.broadcast %31 : f32 to vector<8x128xf32>
    %230 = arith.mulf %200, %229 : vector<8x128xf32>
    %231 = arith.addf %228, %230 : vector<8x128xf32>
    %232 = vector.broadcast %34 : f32 to vector<8x128xf32>
    %233 = arith.addf %231, %232 : vector<8x128xf32>
    %234 = arith.mulf %233, %233 : vector<8x128xf32>
    %cst_33 = arith.constant 0.0356774069 : f32
    %235 = vector.broadcast %cst_33 : f32 to vector<8x128xf32>
    %236 = arith.mulf %235, %234 : vector<8x128xf32>
    %cst_34 = arith.constant 0.797884583 : f32
    %237 = vector.broadcast %cst_34 : f32 to vector<8x128xf32>
    %238 = arith.addf %237, %236 : vector<8x128xf32>
    %239 = arith.mulf %233, %238 : vector<8x128xf32>
    %cst_35 = arith.constant 5.000000e-01 : f32
    %240 = vector.broadcast %cst_35 : f32 to vector<8x128xf32>
    %241 = arith.mulf %240, %233 : vector<8x128xf32>
    %242 = math.tanh %239 : vector<8x128xf32>
    %cst_36 = arith.constant 1.000000e+00 : f32
    %243 = vector.broadcast %cst_36 : f32 to vector<8x128xf32>
    %244 = arith.addf %243, %242 : vector<8x128xf32>
    %245 = arith.mulf %241, %244 : vector<8x128xf32>
    %246 = arith.addf %245, %177 : vector<8x128xf32>
    %247 = vector.broadcast %26 : f32 to vector<8x128xf32>
    %248 = arith.mulf %154, %247 : vector<8x128xf32>
    %249 = vector.broadcast %29 : f32 to vector<8x128xf32>
    %250 = arith.mulf %177, %249 : vector<8x128xf32>
    %251 = arith.addf %248, %250 : vector<8x128xf32>
    %252 = vector.broadcast %32 : f32 to vector<8x128xf32>
    %253 = arith.mulf %200, %252 : vector<8x128xf32>
    %254 = arith.addf %251, %253 : vector<8x128xf32>
    %255 = vector.broadcast %35 : f32 to vector<8x128xf32>
    %256 = arith.addf %254, %255 : vector<8x128xf32>
    %257 = arith.mulf %256, %256 : vector<8x128xf32>
    %cst_37 = arith.constant 0.0356774069 : f32
    %258 = vector.broadcast %cst_37 : f32 to vector<8x128xf32>
    %259 = arith.mulf %258, %257 : vector<8x128xf32>
    %cst_38 = arith.constant 0.797884583 : f32
    %260 = vector.broadcast %cst_38 : f32 to vector<8x128xf32>
    %261 = arith.addf %260, %259 : vector<8x128xf32>
    %262 = arith.mulf %256, %261 : vector<8x128xf32>
    %cst_39 = arith.constant 5.000000e-01 : f32
    %263 = vector.broadcast %cst_39 : f32 to vector<8x128xf32>
    %264 = arith.mulf %263, %256 : vector<8x128xf32>
    %265 = math.tanh %262 : vector<8x128xf32>
    %cst_40 = arith.constant 1.000000e+00 : f32
    %266 = vector.broadcast %cst_40 : f32 to vector<8x128xf32>
    %267 = arith.addf %266, %265 : vector<8x128xf32>
    %268 = arith.mulf %264, %267 : vector<8x128xf32>
    %269 = arith.addf %268, %200 : vector<8x128xf32>
    %270 = vector.broadcast %36 : f32 to vector<8x128xf32>
    %271 = arith.mulf %223, %270 : vector<8x128xf32>
    %272 = vector.broadcast %39 : f32 to vector<8x128xf32>
    %273 = arith.mulf %246, %272 : vector<8x128xf32>
    %274 = arith.addf %271, %273 : vector<8x128xf32>
    %275 = vector.broadcast %42 : f32 to vector<8x128xf32>
    %276 = arith.mulf %269, %275 : vector<8x128xf32>
    %277 = arith.addf %274, %276 : vector<8x128xf32>
    %278 = vector.broadcast %45 : f32 to vector<8x128xf32>
    %279 = arith.addf %277, %278 : vector<8x128xf32>
    %280 = arith.mulf %279, %279 : vector<8x128xf32>
    %cst_41 = arith.constant 0.0356774069 : f32
    %281 = vector.broadcast %cst_41 : f32 to vector<8x128xf32>
    %282 = arith.mulf %281, %280 : vector<8x128xf32>
    %cst_42 = arith.constant 0.797884583 : f32
    %283 = vector.broadcast %cst_42 : f32 to vector<8x128xf32>
    %284 = arith.addf %283, %282 : vector<8x128xf32>
    %285 = arith.mulf %279, %284 : vector<8x128xf32>
    %cst_43 = arith.constant 5.000000e-01 : f32
    %286 = vector.broadcast %cst_43 : f32 to vector<8x128xf32>
    %287 = arith.mulf %286, %279 : vector<8x128xf32>
    %288 = math.tanh %285 : vector<8x128xf32>
    %cst_44 = arith.constant 1.000000e+00 : f32
    %289 = vector.broadcast %cst_44 : f32 to vector<8x128xf32>
    %290 = arith.addf %289, %288 : vector<8x128xf32>
    %291 = arith.mulf %287, %290 : vector<8x128xf32>
    %292 = arith.addf %291, %223 : vector<8x128xf32>
    %293 = vector.broadcast %37 : f32 to vector<8x128xf32>
    %294 = arith.mulf %223, %293 : vector<8x128xf32>
    %295 = vector.broadcast %40 : f32 to vector<8x128xf32>
    %296 = arith.mulf %246, %295 : vector<8x128xf32>
    %297 = arith.addf %294, %296 : vector<8x128xf32>
    %298 = vector.broadcast %43 : f32 to vector<8x128xf32>
    %299 = arith.mulf %269, %298 : vector<8x128xf32>
    %300 = arith.addf %297, %299 : vector<8x128xf32>
    %301 = vector.broadcast %46 : f32 to vector<8x128xf32>
    %302 = arith.addf %300, %301 : vector<8x128xf32>
    %303 = arith.mulf %302, %302 : vector<8x128xf32>
    %cst_45 = arith.constant 0.0356774069 : f32
    %304 = vector.broadcast %cst_45 : f32 to vector<8x128xf32>
    %305 = arith.mulf %304, %303 : vector<8x128xf32>
    %cst_46 = arith.constant 0.797884583 : f32
    %306 = vector.broadcast %cst_46 : f32 to vector<8x128xf32>
    %307 = arith.addf %306, %305 : vector<8x128xf32>
    %308 = arith.mulf %302, %307 : vector<8x128xf32>
    %cst_47 = arith.constant 5.000000e-01 : f32
    %309 = vector.broadcast %cst_47 : f32 to vector<8x128xf32>
    %310 = arith.mulf %309, %302 : vector<8x128xf32>
    %311 = math.tanh %308 : vector<8x128xf32>
    %cst_48 = arith.constant 1.000000e+00 : f32
    %312 = vector.broadcast %cst_48 : f32 to vector<8x128xf32>
    %313 = arith.addf %312, %311 : vector<8x128xf32>
    %314 = arith.mulf %310, %313 : vector<8x128xf32>
    %315 = arith.addf %314, %246 : vector<8x128xf32>
    %316 = vector.broadcast %38 : f32 to vector<8x128xf32>
    %317 = arith.mulf %223, %316 : vector<8x128xf32>
    %318 = vector.broadcast %41 : f32 to vector<8x128xf32>
    %319 = arith.mulf %246, %318 : vector<8x128xf32>
    %320 = arith.addf %317, %319 : vector<8x128xf32>
    %321 = vector.broadcast %44 : f32 to vector<8x128xf32>
    %322 = arith.mulf %269, %321 : vector<8x128xf32>
    %323 = arith.addf %320, %322 : vector<8x128xf32>
    %324 = vector.broadcast %47 : f32 to vector<8x128xf32>
    %325 = arith.addf %323, %324 : vector<8x128xf32>
    %326 = arith.mulf %325, %325 : vector<8x128xf32>
    %cst_49 = arith.constant 0.0356774069 : f32
    %327 = vector.broadcast %cst_49 : f32 to vector<8x128xf32>
    %328 = arith.mulf %327, %326 : vector<8x128xf32>
    %cst_50 = arith.constant 0.797884583 : f32
    %329 = vector.broadcast %cst_50 : f32 to vector<8x128xf32>
    %330 = arith.addf %329, %328 : vector<8x128xf32>
    %331 = arith.mulf %325, %330 : vector<8x128xf32>
    %cst_51 = arith.constant 5.000000e-01 : f32
    %332 = vector.broadcast %cst_51 : f32 to vector<8x128xf32>
    %333 = arith.mulf %332, %325 : vector<8x128xf32>
    %334 = math.tanh %331 : vector<8x128xf32>
    %cst_52 = arith.constant 1.000000e+00 : f32
    %335 = vector.broadcast %cst_52 : f32 to vector<8x128xf32>
    %336 = arith.addf %335, %334 : vector<8x128xf32>
    %337 = arith.mulf %333, %336 : vector<8x128xf32>
    %338 = arith.addf %337, %269 : vector<8x128xf32>
    %339 = vector.broadcast %48 : f32 to vector<8x128xf32>
    %340 = arith.mulf %292, %339 : vector<8x128xf32>
    %341 = vector.broadcast %49 : f32 to vector<8x128xf32>
    %342 = arith.mulf %315, %341 : vector<8x128xf32>
    %343 = arith.addf %340, %342 : vector<8x128xf32>
    %344 = vector.broadcast %50 : f32 to vector<8x128xf32>
    %345 = arith.mulf %338, %344 : vector<8x128xf32>
    %346 = arith.addf %343, %345 : vector<8x128xf32>
    %347 = vector.broadcast %51 : f32 to vector<8x128xf32>
    %348 = arith.addf %346, %347 : vector<8x128xf32>
    %349 = arith.mulf %348, %348 : vector<8x128xf32>
    %cst_53 = arith.constant 0.0356774069 : f32
    %350 = vector.broadcast %cst_53 : f32 to vector<8x128xf32>
    %351 = arith.mulf %350, %349 : vector<8x128xf32>
    %cst_54 = arith.constant 0.797884583 : f32
    %352 = vector.broadcast %cst_54 : f32 to vector<8x128xf32>
    %353 = arith.addf %352, %351 : vector<8x128xf32>
    %354 = arith.mulf %348, %353 : vector<8x128xf32>
    %cst_55 = arith.constant 5.000000e-01 : f32
    %355 = vector.broadcast %cst_55 : f32 to vector<8x128xf32>
    %356 = arith.mulf %355, %348 : vector<8x128xf32>
    %357 = math.tanh %354 : vector<8x128xf32>
    %cst_56 = arith.constant 1.000000e+00 : f32
    %358 = vector.broadcast %cst_56 : f32 to vector<8x128xf32>
    %359 = arith.addf %358, %357 : vector<8x128xf32>
    %360 = arith.mulf %356, %359 : vector<8x128xf32>
    %c0_57 = arith.constant 0 : index
    %361 = arith.index_cast %53 : i32 to index
    %c0_58 = arith.constant 0 : index
    %362 = vector.load %arg3[%c0_57, %361, %c0_58] : memref<1x8x128xf32, #tpu.memory_space<vmem>>, vector<1x8x128xf32>
    %363 = vector.shape_cast %362 : vector<1x8x128xf32> to vector<8x128xf32>
    %364 = vector.shape_cast %360 : vector<8x128xf32> to vector<1x8x128xf32>
    tpu.vector_store %arg3[%c0_57, %361, %c0_58], %364 {strides = array<i32>} : memref<1x8x128xf32, #tpu.memory_space<vmem>>, vector<1x8x128xf32>,
    %c1_i32 = arith.constant 1 : i32
    return
  }
  func.func @transform_0(%arg0: i32) -> i32 {
    %c0_i32 = arith.constant 0 : i32
    %c0_i32_0 = arith.constant 0 : i32
    return %c0_i32 : i32
  }
  func.func @transform_1(%arg0: i32) -> (i32, i32, i32) {
    %c0_i32 = arith.constant 0 : i32
    %c0_i32_0 = arith.constant 0 : i32
    %c0_i32_1 = arith.constant 0 : i32
    return %c0_i32, %arg0, %c0_i32_0 : i32, i32, i32
  }
  func.func @transform_2(%arg0: i32) -> (i32, i32, i32) {
    %c0_i32 = arith.constant 0 : i32
    %c0_i32_0 = arith.constant 0 : i32
    %c0_i32_1 = arith.constant 0 : i32
    return %c0_i32, %arg0, %c0_i32_0 : i32, i32, i32
  }
}

</mosaic_0001>

<bundles_post_ra>
// kernel: tpu_custom_call.1
= control target key start
LH: loop header
LB: loop body
LE: loop exit
PB: predicated region body
PF: predicated region fallthrough
CT: control target
= control target key end

     0   :  { %7 = vsyncpa [#allocation5], 0  ;;  %s706_s0 = inlined_call_operand.hbm [shape: f32[52], index: 0, kind: input, shape index: {}]   ;;  %s707_s1 = inlined_call_operand.hbm [shape: f32[3,8,128], index: 1, kind: input, shape index: {}]   ;;  %s708_s2 = inlined_call_operand.hbm [shape: f32[1,8,128], index: 2, kind: output, shape index: {}]  }
   0x1   :  { %8 = vsyncpa [#allocation3], 0 }
   0x2   :  { %9 = vsyncpa [#allocation4], 0  ;;  %s15_s11 = sshll.u32 %s706_s0, 4  ;;  %s23_s14 = sshll.u32 %s707_s1, 4  ;;  %s16_s11 = int_to_ptr.hbm [resolvable:$true] %s15_s11  ;;  %s24_s14 = int_to_ptr.hbm [resolvable:$true] %s23_s14 }
   0x3   :  { %s515_s15 = smov [#allocation2]   ;;  %s516_s16 = smov [#allocation6]  }
   0x4   :  { %18 = dma.hbm_to_smem %s16_s11, 16, %s515_s15, [#allocation5]  }
   0x5   :  { %s25_s17 = sshll.u32 %s516_s16, 4  ;;  %s517_s18 = smov 128   ;;  %s26_s17 = int_to_ptr.vmem [resolvable:$true] %s25_s17 }
   0x6   :  { %s518_s19 = smov 8  }
   0x7   :  { %31 = dma.hbm_to_vmem [thread:$0]  %s24_s14, 384, %s26_s17, [#allocation3], %s517_s18, %s517_s18, %s518_s19  }
   0x8   :  { %509 = dma.done.wait [#allocation5], 16  }
   0x9   :  { %510 = vsyncadd [#allocation5], 4294967280 }
   0xa   :  { %511 = dma.done.wait [#allocation3], 384  }
   0xb   :  { %512 = vsyncadd [#allocation3], 4294966912 }
   0xc   :  { %40 = sfence }
   0xd   :  { %s41_s0 = sld [smem:[#allocation2]]  ;;  %v541_v0 = vld [vmem:[#allocation6] sm:$0xff]  ;;  %v543_v2 = vld [vmem:[#allocation6 + $0x8] sm:$0xff]  ;;  %v547_v8 = vld [vmem:[#allocation6 + $0x10] sm:$0xff] }
   0xe   :  { %s367_s20 = sld [smem:[#allocation2 + $0x1]] }
   0xf   :  { %s368_s21 = sld [smem:[#allocation2 + $0x2]] }
  0x10   :  { %s369_s22 = sld [smem:[#allocation2 + $0x3]] }
  0x11   :  { %s370_s23 = sld [smem:[#allocation2 + $0x4]] }
  0x12   :  { %s371_s1 = sld [smem:[#allocation2 + $0x5]] }
  0x13   :  { %s372_s24 = sld [smem:[#allocation2 + $0x6]]  ;;  %v100_v1 = vstv %s41_s0 }
  0x14   :  { %s373_s25 = sld [smem:[#allocation2 + $0x7]]  ;;  %v119_v3 = vstv %s367_s20  ;;  %v101_v4 = vmul.f32 %v100_v1, %v541_v0 }
  0x15   :  { %s374_s26 = sld [smem:[#allocation2 + $0x8]]  ;;  %v138_v5 = vstv %s368_s21  ;;  %v120_v7 = vmul.f32 %v119_v3, %v541_v0 }
  0x16   :  { %s375_s27 = sld [smem:[#allocation2 + $0x9]]  ;;  %v102_v6 = vstv %s369_s22  ;;  %v139_v11 = vmul.f32 %v138_v5, %v541_v0 }
  0x17   :  { %s376_s28 = sld [smem:[#allocation2 + $0xa]]  ;;  %v103_v9 = vmul.f32 %v102_v6, %v543_v2  ;;  %v121_v10 = vstv %s370_s23 }
  0x18   :  { %s377_s29 = sld [smem:[#allocation2 + $0xb]]  ;;  %v122_v12 = vmul.f32 %v121_v10, %v543_v2  ;;  %v140_v13 = vstv %s371_s1 }
  0x19   :  { %v104_v14 = vadd.f32 %v103_v9, %v101_v4  ;;  %v105_v15 = vstv %s372_s24  ;;  %v141_v16 = vmul.f32 %v140_v13, %v543_v2  ;;  %s556_s30 = sld [smem:[#allocation2 + $0xc]] }
  0x1a   :  { %v106_v17 = vmul.f32 %v105_v15, %v547_v8  ;;  %v123_v18 = vadd.f32 %v122_v12, %v120_v7  ;;  %v124_v19 = vstv %s373_s25  ;;  %s558_s3 = sld [smem:[#allocation2 + $0xd]] }
  0x1b   :  { %v125_v20 = vmul.f32 %v124_v19, %v547_v8  ;;  %v142_v21 = vadd.f32 %v141_v16, %v139_v11  ;;  %v143_v22 = vstv %s374_s26  ;;  %s560_s4 = sld [smem:[#allocation2 + $0xe]] }
  0x1c   :  { %v107_v23 = vadd.f32 %v106_v17, %v104_v14  ;;  %v108_v24 = vstv %s375_s27  ;;  %v144_v25 = vmul.f32 %v143_v22, %v547_v8  ;;  %s562_s5 = sld [smem:[#allocation2 + $0xf]] }
  0x1d   :  { %v126_v26 = vadd.f32 %v125_v20, %v123_v18  ;;  %v127_v27 = vstv %s376_s28  ;;  %s564_s6 = sld [smem:[#allocation2 + $0x10]] }
  0x1e   :  { %v109_v28 = vadd.f32 %v108_v24, %v107_v23  ;;  %v145_v29 = vadd.f32 %v144_v25, %v142_v21  ;;  %v146_v30 = vstv %s377_s29  ;;  %s566_s7 = sld [smem:[#allocation2 + $0x11]] }
  0x1f   :  { %v128_v31 = vadd.f32 %v127_v27, %v126_v26  ;;  %s568_s8 = sld [smem:[#allocation2 + $0x12]]  ;;  %v157_v55 = vstv %s556_s30 }
  0x20   :  { %v110_v32 = vmul.f32 %v109_v28, %v109_v28  ;;  %v147_v33 = vadd.f32 %v146_v30, %v145_v29  ;;  %s570_s9 = sld [smem:[#allocation2 + $0x13]]  ;;  %v114_v45 = vmul.f32 0.5, %v109_v28  ;;  %v176_v58 = vstv %s558_s3 }
  0x21   :  { %v129_v34 = vmul.f32 %v128_v31, %v128_v31  ;;  %s572_s10 = sld [smem:[#allocation2 + $0x14]]  ;;  %v133_v47 = vmul.f32 0.5, %v128_v31  ;;  %v195_v59 = vstv %s560_s4 }
  0x22   :  { %v111_v35 = vmul.f32 0.035677407, %v110_v32  ;;  %v148_v36 = vmul.f32 %v147_v33, %v147_v33  ;;  %s574_s11 = sld [smem:[#allocation2 + $0x15]]  ;;  %v152_v50 = vmul.f32 0.5, %v147_v33  ;;  %v159_v57 = vstv %s562_s5 }
  0x23   :  { %v130_v37 = vmul.f32 0.035677407, %v129_v34  ;;  %s576_s12 = sld [smem:[#allocation2 + $0x16]]  ;;  %v178_v62 = vstv %s564_s6 }
  0x24   :  { %v112_v38 = vadd.f32 0.7978846, %v111_v35  ;;  %v149_v39 = vmul.f32 0.035677407, %v148_v36  ;;  %s578_s13 = sld [smem:[#allocation2 + $0x17]]  ;;  %v197_v63 = vstv %s566_s7 }
  0x25   :  { %v131_v40 = vadd.f32 0.7978846, %v130_v37  ;;  %v162_v3 = vstv %s568_s8  ;;  %s610_s14 = sld [smem:[#allocation2 + $0x18]] }
  0x26   :  { %v113_v41 = vmul.f32 %v112_v38, %v109_v28  ;;  %v150_v42 = vadd.f32 0.7978846, %v149_v39  ;;  %v181_v4 = vstv %s570_s9  ;;  %s612_s15 = sld [smem:[#allocation2 + $0x19]] }
  0x27   :  { %v132_v43 = vmul.f32 %v131_v40, %v128_v31  ;;  %v200_v5 = vstv %s572_s10  ;;  %s614_s16 = sld [smem:[#allocation2 + $0x1a]] }
  0x28   :  { %423 = vtanh.f32 %v113_v41  ;;  %v151_v44 = vmul.f32 %v150_v42, %v147_v33  ;;  %v165_v17 = vstv %s574_s11  ;;  %s616_s17 = sld [smem:[#allocation2 + $0x1b]] }
  0x29   :  { %425 = vtanh.f32 %v132_v43  ;;  %v184_v18 = vstv %s576_s12  ;;  %s618_s18 = sld [smem:[#allocation2 + $0x1c]]  ;;  %s519_s12 = smov [#allocation7]  }
  0x2a   :  { %427 = vtanh.f32 %v151_v44  ;;  %v203_v19 = vstv %s578_s13  ;;  %s620_s19 = sld [smem:[#allocation2 + $0x1d]]  ;;  %s352_s13 = sshll.u32 %s519_s12, 4  ;;  %s353_s13 = int_to_ptr.vmem [resolvable:$true] %s352_s13 }
  0x2b   :  { %s622_s0 = sld [smem:[#allocation2 + $0x1e]] }
  0x2c   :  { %s624_s20 = sld [smem:[#allocation2 + $0x1f]] }
  0x2d   :  { %s626_s21 = sld [smem:[#allocation2 + $0x20]] }
  0x2e   :  { %v424_v46 = vpop.eup %423  ;;  %s628_s22 = sld [smem:[#allocation2 + $0x21]] }
  0x2f   :  { %v426_v48 = vpop.eup %425  ;;  %v116_v49 = vadd.f32 1.0, %v424_v46  ;;  %s630_s23 = sld [smem:[#allocation2 + $0x22]] }
  0x30   :  { %v428_v51 = vpop.eup %427  ;;  %v135_v52 = vadd.f32 1.0, %v426_v48  ;;  %s632_s1 = sld [smem:[#allocation2 + $0x23]]  ;;  %v214_v48 = vstv %s610_s14 }
  0x31   :  { %v117_v53 = vmul.f32 %v116_v49, %v114_v45  ;;  %v154_v54 = vadd.f32 1.0, %v428_v51  ;;  %v233_v51 = vstv %s612_s15  ;;  %s664_s24 = sld [smem:[#allocation2 + $0x24]] }
  0x32   :  { %v136_v56 = vmul.f32 %v135_v52, %v133_v47  ;;  %v252_v52 = vstv %s614_s16  ;;  %s666_s25 = sld [smem:[#allocation2 + $0x25]]  ;;  %s354_s16 = sshll.u32 %s708_s2, 4  ;;  %s355_s16 = int_to_ptr.hbm [resolvable:$true] %s354_s16 }
  0x33   :  { %v585_v60 = vadd.f32 %v117_v53, %v541_v0  ;;  %v155_v61 = vmul.f32 %v154_v54, %v152_v50  ;;  %v216_v50 = vstv %s616_s17  ;;  %s668_s26 = sld [smem:[#allocation2 + $0x26]] }
  0x34   :  { %v590_v1 = vadd.f32 %v136_v56, %v543_v2  ;;  %v254_v56 = vstv %s620_s19  ;;  %s670_s27 = sld [smem:[#allocation2 + $0x27]] }
  0x35   :  { %v596_v6 = vadd.f32 %v155_v61, %v547_v8  ;;  %v158_v7 = vmul.f32 %v157_v55, %v585_v60  ;;  %v177_v0 = vmul.f32 %v176_v58, %v585_v60  ;;  %v196_v9 = vmul.f32 %v195_v59, %v585_v60  ;;  %s672_s28 = sld [smem:[#allocation2 + $0x28]] }
  0x36   :  { %v160_v10 = vmul.f32 %v159_v57, %v590_v1  ;;  %v179_v2 = vmul.f32 %v178_v62, %v590_v1  ;;  %v198_v11 = vmul.f32 %v197_v63, %v590_v1  ;;  %v235_v55 = vstv %s618_s18  ;;  %s674_s29 = sld [smem:[#allocation2 + $0x29]] }
  0x37   :  { %v163_v12 = vmul.f32 %v162_v3, %v596_v6  ;;  %v182_v13 = vmul.f32 %v181_v4, %v596_v6  ;;  %v201_v14 = vmul.f32 %v200_v5, %v596_v6  ;;  %v219_v58 = vstv %s622_s0  ;;  %s676_s30 = sld [smem:[#allocation2 + $0x2a]] }
  0x38   :  { %v161_v8 = vadd.f32 %v160_v10, %v158_v7  ;;  %v180_v15 = vadd.f32 %v179_v2, %v177_v0  ;;  %v199_v16 = vadd.f32 %v198_v11, %v196_v9  ;;  %v238_v59 = vstv %s624_s20  ;;  %s678_s3 = sld [smem:[#allocation2 + $0x2b]] }
  0x39   :  { %v257_v61 = vstv %s626_s21  ;;  %v222_v11 = vstv %s628_s22  ;;  %s680_s4 = sld [smem:[#allocation2 + $0x2c]] }
  0x3a   :  { %v164_v20 = vadd.f32 %v163_v12, %v161_v8  ;;  %v183_v21 = vadd.f32 %v182_v13, %v180_v15  ;;  %v202_v22 = vadd.f32 %v201_v14, %v199_v16  ;;  %v241_v12 = vstv %s630_s23  ;;  %s682_s5 = sld [smem:[#allocation2 + $0x2d]] }
  0x3b   :  { %v260_v13 = vstv %s632_s1  ;;  %s684_s6 = sld [smem:[#allocation2 + $0x2e]] }
  0x3c   :  { %v166_v23 = vadd.f32 %v165_v17, %v164_v20  ;;  %v185_v24 = vadd.f32 %v184_v18, %v183_v21  ;;  %v204_v25 = vadd.f32 %v203_v19, %v202_v22  ;;  %s686_s7 = sld [smem:[#allocation2 + $0x2f]] }
  0x3d   :  { %s414_s8 = sld [smem:[#allocation2 + $0x30]] }
  0x3e   :  { %v167_v26 = vmul.f32 %v166_v23, %v166_v23  ;;  %v186_v27 = vmul.f32 %v185_v24, %v185_v24  ;;  %v205_v28 = vmul.f32 %v204_v25, %v204_v25  ;;  %v171_v38 = vmul.f32 0.5, %v166_v23  ;;  %s415_s9 = sld [smem:[#allocation2 + $0x31]] }
  0x3f   :  { %v190_v40 = vmul.f32 0.5, %v185_v24  ;;  %v209_v43 = vmul.f32 0.5, %v204_v25  ;;  %s416_s10 = sld [smem:[#allocation2 + $0x32]] }
  0x40   :  { %v168_v29 = vmul.f32 0.035677407, %v167_v26  ;;  %v187_v30 = vmul.f32 0.035677407, %v186_v27  ;;  %v206_v31 = vmul.f32 0.035677407, %v205_v28 }
  0x41   :  { %s417_s11 = sld [smem:[#allocation2 + $0x33]] }
  0x42   :  { %v169_v32 = vadd.f32 0.7978846, %v168_v29  ;;  %v188_v33 = vadd.f32 0.7978846, %v187_v30  ;;  %v207_v34 = vadd.f32 0.7978846, %v206_v31 }
  0x44   :  { %v170_v35 = vmul.f32 %v169_v32, %v166_v23  ;;  %v189_v36 = vmul.f32 %v188_v33, %v185_v24  ;;  %v208_v37 = vmul.f32 %v207_v34, %v204_v25 }
  0x46   :  { %429 = vtanh.f32 %v170_v35 }
  0x47   :  { %431 = vtanh.f32 %v189_v36 }
  0x48   :  { %433 = vtanh.f32 %v208_v37 }
  0x4c   :  { %v430_v39 = vpop.eup %429 }
  0x4d   :  { %v432_v41 = vpop.eup %431  ;;  %v173_v42 = vadd.f32 1.0, %v430_v39 }
  0x4e   :  { %v434_v44 = vpop.eup %433  ;;  %v192_v45 = vadd.f32 1.0, %v432_v41  ;;  %v271_v41 = vstv %s664_s24 }
  0x4f   :  { %v174_v46 = vmul.f32 %v173_v42, %v171_v38  ;;  %v211_v47 = vadd.f32 1.0, %v434_v44  ;;  %v290_v44 = vstv %s666_s25 }
  0x50   :  { %v193_v49 = vmul.f32 %v192_v45, %v190_v40  ;;  %v309_v45 = vstv %s668_s26 }
  0x51   :  { %v639_v53 = vadd.f32 %v174_v46, %v585_v60  ;;  %v212_v54 = vmul.f32 %v211_v47, %v209_v43  ;;  %v273_v43 = vstv %s670_s27 }
  0x52   :  { %v644_v57 = vadd.f32 %v193_v49, %v590_v1  ;;  %v311_v49 = vstv %s674_s29 }
  0x53   :  { %v650_v62 = vadd.f32 %v212_v54, %v596_v6  ;;  %v215_v63 = vmul.f32 %v214_v48, %v639_v53  ;;  %v234_v60 = vmul.f32 %v233_v51, %v639_v53  ;;  %v253_v3 = vmul.f32 %v252_v52, %v639_v53 }
  0x54   :  { %v217_v4 = vmul.f32 %v216_v50, %v644_v57  ;;  %v236_v1 = vmul.f32 %v235_v55, %v644_v57  ;;  %v255_v5 = vmul.f32 %v254_v56, %v644_v57  ;;  %v292_v48 = vstv %s672_s28 }
  0x55   :  { %v220_v7 = vmul.f32 %v219_v58, %v650_v62  ;;  %v239_v0 = vmul.f32 %v238_v59, %v650_v62  ;;  %v258_v9 = vmul.f32 %v257_v61, %v650_v62  ;;  %v276_v51 = vstv %s676_s30 }
  0x56   :  { %v218_v6 = vadd.f32 %v217_v4, %v215_v63  ;;  %v237_v10 = vadd.f32 %v236_v1, %v234_v60  ;;  %v256_v2 = vadd.f32 %v255_v5, %v253_v3  ;;  %v295_v52 = vstv %s678_s3 }
  0x57   :  { %v314_v54 = vstv %s680_s4 }
  0x58   :  { %v221_v14 = vadd.f32 %v220_v7, %v218_v6  ;;  %v240_v8 = vadd.f32 %v239_v0, %v237_v10  ;;  %v259_v15 = vadd.f32 %v258_v9, %v256_v2  ;;  %v279_v7 = vstv %s682_s5 }
  0x59   :  { %v298_v0 = vstv %s684_s6  ;;  %v317_v9 = vstv %s686_s7 }
  0x5a   :  { %v223_v16 = vadd.f32 %v222_v11, %v221_v14  ;;  %v242_v17 = vadd.f32 %v241_v12, %v240_v8  ;;  %v261_v18 = vadd.f32 %v260_v13, %v259_v15 }
  0x5c   :  { %v224_v19 = vmul.f32 %v223_v16, %v223_v16  ;;  %v243_v20 = vmul.f32 %v242_v17, %v242_v17  ;;  %v262_v21 = vmul.f32 %v261_v18, %v261_v18  ;;  %v228_v31 = vmul.f32 0.5, %v223_v16 }
  0x5d   :  { %v247_v33 = vmul.f32 0.5, %v242_v17  ;;  %v266_v36 = vmul.f32 0.5, %v261_v18 }
  0x5e   :  { %v225_v22 = vmul.f32 0.035677407, %v224_v19  ;;  %v244_v23 = vmul.f32 0.035677407, %v243_v20  ;;  %v263_v24 = vmul.f32 0.035677407, %v262_v21 }
  0x60   :  { %v226_v25 = vadd.f32 0.7978846, %v225_v22  ;;  %v245_v26 = vadd.f32 0.7978846, %v244_v23  ;;  %v264_v27 = vadd.f32 0.7978846, %v263_v24 }
  0x62   :  { %v227_v28 = vmul.f32 %v226_v25, %v223_v16  ;;  %v246_v29 = vmul.f32 %v245_v26, %v242_v17  ;;  %v265_v30 = vmul.f32 %v264_v27, %v261_v18 }
  0x64   :  { %435 = vtanh.f32 %v227_v28 }
  0x65   :  { %437 = vtanh.f32 %v246_v29 }
  0x66   :  { %439 = vtanh.f32 %v265_v30 }
  0x6a   :  { %v436_v32 = vpop.eup %435 }
  0x6b   :  { %v438_v34 = vpop.eup %437  ;;  %v230_v35 = vadd.f32 1.0, %v436_v32 }
  0x6c   :  { %v440_v37 = vpop.eup %439  ;;  %v249_v38 = vadd.f32 1.0, %v438_v34 }
  0x6d   :  { %v231_v39 = vmul.f32 %v230_v35, %v228_v31  ;;  %v268_v40 = vadd.f32 1.0, %v440_v37  ;;  %v328_v35 = vstv %s414_s8 }
  0x6e   :  { %v250_v42 = vmul.f32 %v249_v38, %v247_v33  ;;  %v330_v38 = vstv %s415_s9 }
  0x6f   :  { %v232_v46 = vadd.f32 %v231_v39, %v639_v53  ;;  %v269_v47 = vmul.f32 %v268_v40, %v266_v36  ;;  %v333_v40 = vstv %s416_s10 }
  0x70   :  { %v251_v50 = vadd.f32 %v250_v42, %v644_v57 }
  0x71   :  { %v270_v55 = vadd.f32 %v269_v47, %v650_v62  ;;  %v272_v56 = vmul.f32 %v271_v41, %v232_v46  ;;  %v291_v58 = vmul.f32 %v290_v44, %v232_v46  ;;  %v310_v59 = vmul.f32 %v309_v45, %v232_v46 }
  0x72   :  { %v274_v61 = vmul.f32 %v273_v43, %v251_v50  ;;  %v293_v63 = vmul.f32 %v292_v48, %v251_v50  ;;  %v312_v60 = vmul.f32 %v311_v49, %v251_v50  ;;  %v336_v47 = vstv %s417_s11 }
  0x73   :  { %v277_v53 = vmul.f32 %v276_v51, %v270_v55  ;;  %v296_v3 = vmul.f32 %v295_v52, %v270_v55  ;;  %v315_v4 = vmul.f32 %v314_v54, %v270_v55 }
  0x74   :  { %v275_v1 = vadd.f32 %v274_v61, %v272_v56  ;;  %v294_v5 = vadd.f32 %v293_v63, %v291_v58  ;;  %v313_v57 = vadd.f32 %v312_v60, %v310_v59 }
  0x76   :  { %v278_v6 = vadd.f32 %v277_v53, %v275_v1  ;;  %v297_v10 = vadd.f32 %v296_v3, %v294_v5  ;;  %v316_v2 = vadd.f32 %v315_v4, %v313_v57 }
  0x78   :  { %v280_v11 = vadd.f32 %v279_v7, %v278_v6  ;;  %v299_v62 = vadd.f32 %v298_v0, %v297_v10  ;;  %v318_v12 = vadd.f32 %v317_v9, %v316_v2 }
  0x7a   :  { %v281_v13 = vmul.f32 %v280_v11, %v280_v11  ;;  %v300_v14 = vmul.f32 %v299_v62, %v299_v62  ;;  %v319_v8 = vmul.f32 %v318_v12, %v318_v12  ;;  %v285_v24 = vmul.f32 0.5, %v280_v11 }
  0x7b   :  { %v304_v26 = vmul.f32 0.5, %v299_v62  ;;  %v323_v29 = vmul.f32 0.5, %v318_v12 }
  0x7c   :  { %v282_v15 = vmul.f32 0.035677407, %v281_v13  ;;  %v301_v16 = vmul.f32 0.035677407, %v300_v14  ;;  %v320_v17 = vmul.f32 0.035677407, %v319_v8 }
  0x7e   :  { %v283_v18 = vadd.f32 0.7978846, %v282_v15  ;;  %v302_v19 = vadd.f32 0.7978846, %v301_v16  ;;  %v321_v20 = vadd.f32 0.7978846, %v320_v17 }
  0x80   :  { %v284_v21 = vmul.f32 %v283_v18, %v280_v11  ;;  %v303_v22 = vmul.f32 %v302_v19, %v299_v62  ;;  %v322_v23 = vmul.f32 %v321_v20, %v318_v12 }
  0x82   :  { %441 = vtanh.f32 %v284_v21 }
  0x83   :  { %443 = vtanh.f32 %v303_v22 }
  0x84   :  { %445 = vtanh.f32 %v322_v23 }
  0x88   :  { %v442_v25 = vpop.eup %441 }
  0x89   :  { %v444_v27 = vpop.eup %443  ;;  %v287_v28 = vadd.f32 1.0, %v442_v25 }
  0x8a   :  { %v446_v30 = vpop.eup %445  ;;  %v306_v31 = vadd.f32 1.0, %v444_v27 }
  0x8b   :  { %v288_v32 = vmul.f32 %v287_v28, %v285_v24  ;;  %v325_v33 = vadd.f32 1.0, %v446_v30 }
  0x8c   :  { %v307_v34 = vmul.f32 %v306_v31, %v304_v26 }
  0x8d   :  { %v289_v36 = vadd.f32 %v288_v32, %v232_v46  ;;  %v326_v37 = vmul.f32 %v325_v33, %v323_v29 }
  0x8e   :  { %v308_v39 = vadd.f32 %v307_v34, %v251_v50 }
  0x8f   :  { %v327_v41 = vadd.f32 %v326_v37, %v270_v55  ;;  %v329_v42 = vmul.f32 %v328_v35, %v289_v36 }
  0x90   :  { %v331_v43 = vmul.f32 %v330_v38, %v308_v39 }
  0x91   :  { %v334_v44 = vmul.f32 %v333_v40, %v327_v41 }
  0x92   :  { %v332_v45 = vadd.f32 %v331_v43, %v329_v42 }
  0x94   :  { %v335_v48 = vadd.f32 %v334_v44, %v332_v45 }
  0x96   :  { %v337_v49 = vadd.f32 %v336_v47, %v335_v48 }
  0x98   :  { %v338_v51 = vmul.f32 %v337_v49, %v337_v49  ;;  %v342_v58 = vmul.f32 0.5, %v337_v49 }
  0x9a   :  { %v339_v52 = vmul.f32 0.035677407, %v338_v51 }
  0x9c   :  { %v340_v54 = vadd.f32 0.7978846, %v339_v52 }
  0x9e   :  { %v341_v56 = vmul.f32 %v340_v54, %v337_v49 }
  0xa0   :  { %447 = vtanh.f32 %v341_v56 }
  0xa6   :  { %v448_v59 = vpop.eup %447 }
  0xa7   :  { %v344_v46 = vadd.f32 1.0, %v448_v59 }
  0xa9   :  { %v345_v50 = vmul.f32 %v344_v46, %v342_v58 }
  0xab   :  { %346 = vst [vmem:[#allocation7] sm:$0xff] %v345_v50 }
  0xac   :  { %357 = dma.vmem_to_hbm [thread:$0]  %s353_s13, 128, %s355_s16, [#allocation4]  }
  0xad   :  { %513 = dma.done.wait [#allocation4], 128  }
  0xae   :  { %514 = vsyncadd [#allocation4], 4294967168 }
  0xaf   :  { %362 = vsyncpa [#allocation3], 1 }
  0xb0   :  { %363 = vsyncpa [#allocation4], 1 }
  0xb1   :  { %364 = vsyncpa [#allocation5], 1 }

</bundles_post_ra>
